<compile_context>
chip_gen: v5e
topology: v5e:2x2
jax: 0.10.0
libtpu: 0.0.40
codegen_flags: <defaults>
</compile_context>

<pallas_src>
import numpy as np
import jax
import jax.numpy as jnp
from jax.experimental import pallas as pl
from jax.experimental.pallas import tpu as pltpu


def _round_up(a, m):
    return ((a + m - 1) // m) * m


_TILE_B_MAX = 512                    # batch-tile cap (sublane axis)
_VMEM_BUDGET = 20 * 1024 * 1024      # conservative per-step working-set budget


def build_dense_terms(coefficients, n_vars):
    """Densify the sparse coefficient dict into MXU-friendly operands.

    Returns (sel_all, coef, meta):
      sel_all : (N_DIM, n_blocks * D * TILE_T) bf16 one-hot selection, block-major /
                degree-major along the lane axis.  N_DIM = n_vars + 1 rounded to a multiple
                of 8 (NOT 128), so x is not inflated.
      coef    : (1, T_PAD) f32 per-term coefficients.  NOTE: the `()` term's coefficient is
                DOUBLED on purpose -- the reference forward initializes the running sum with
                coefficients[()] and then ALSO adds the `()` term inside its loop.
      meta    : dict with D, N_DIM, T_PAD, TILE_T, ONES_COL.
    """
    coeffs = dict(coefficients)
    if () not in coeffs:
        coeffs[()] = 0
    keys = [tuple(sorted(k)) for k in coeffs.keys()]
    vals = [float(v) for v in coeffs.values()]
    n_terms = len(keys)
    deg = max(1, max((len(k) for k in keys), default=1))

    n_dim = _round_up(n_vars + 1, 8)      # +1 constant-1 column; sublane-aligned only
    ones_col = n_vars

    # Term-tile size: keep the per-step working set (gather output + product temporaries +
    # double-buffered bf16 sel + its f32 cast) inside the VMEM budget.
    per_tile_t = _TILE_B_MAX * 4 * (deg + 2) + n_dim * deg * 8
    max_tile_t = max(128, (_VMEM_BUDGET // per_tile_t) // 128 * 128)
    tile_t = int(min(max_tile_t, _round_up(n_terms, 128)))
    t_pad = _round_up(n_terms, tile_t)
    n_blocks = t_pad // tile_t

    sel = np.zeros((deg, n_dim, t_pad), dtype=np.float32)
    coef = np.zeros((1, t_pad), dtype=np.float32)
    for t, (k, v) in enumerate(zip(keys, vals)):
        # Empty-term coefficient doubled on purpose (matches the reference's double count).
        coef[0, t] = 2.0 * v if len(k) == 0 else v
        for j in range(deg):
            if j < len(k):
                sel[j, k[j], t] = 1.0
            else:
                sel[j, ones_col, t] = 1.0     # padded degree slot -> constant-1 column
    # Padded term columns (t >= n_terms) stay all-zero with coef 0 -> contribute exactly 0.

    # (deg, n_dim, t_pad) -> (n_dim, n_blocks * deg * tile_t): block-major, then degree-major,
    # so one lane-contiguous slice of width deg*tile_t holds all degree panels of one block.
    sel_all = (sel.reshape(deg, n_dim, n_blocks, tile_t)
                  .transpose(1, 2, 0, 3)
                  .reshape(n_dim, n_blocks * deg * tile_t))

    sel_all = jnp.asarray(sel_all).astype(jnp.bfloat16)   # 0/1 values are exact in bf16
    coef = jnp.asarray(coef)
    meta = dict(D=deg, N_DIM=n_dim, T_PAD=t_pad, TILE_T=tile_t, ONES_COL=ones_col)
    return sel_all, coef, meta


def _make_kernel(deg, tile_t):
    def kernel(x_ref, sel_ref, coef_ref, out_ref):
        # Output block is VMEM-resident across the term axis -> accumulate into it directly.
        @pl.when(pl.program_id(1) == 0)
        def _init():
            out_ref[...] = jnp.zeros_like(out_ref)

        x = x_ref[...]                                   # (TILE_B, N_DIM) f32
        sel = sel_ref[...].astype(jnp.float32)           # bf16 0/1 -> f32 (exact)
        # One wide MXU gather: all degree slots of all terms in this tile in one matmul.
        g = jnp.dot(x, sel, preferred_element_type=jnp.float32)   # (TILE_B, D*TILE_T)

        prod = g[:, :tile_t]
        for j in range(1, deg):                          # static unroll over max degree
            prod = prod * g[:, j * tile_t:(j + 1) * tile_t]

        # Coefficient multiply on the VPU, term reduction on the XLU lane reduce.
        out_ref[...] += jnp.sum(prod * coef_ref[...], axis=-1, keepdims=True)

    return kernel


def sparse_polynomial(x, sel_all, coef, meta):
    """Evaluate the densified sparse polynomial; returns x.shape[:-1] + (1,) float32."""
    deg, n_dim, t_pad, tile_t = meta["D"], meta["N_DIM"], meta["T_PAD"], meta["TILE_T"]

    orig_shape = x.shape
    n = orig_shape[-1]
    x2 = jnp.reshape(x, (-1, n)).astype(jnp.float32)
    b = x2.shape[0]

    tile_b = int(min(_TILE_B_MAX, _round_up(b, 8)))
    b_pad = _round_up(b, tile_b)

    # Append the constant-1 column (used by padded degree slots), zero-pad the variable axis
    # only up to a multiple of 8 and the batch axis up to b_pad.
    x_aug = jnp.concatenate(
        [x2,
         jnp.ones((b, 1), jnp.float32),
         jnp.zeros((b, n_dim - n - 1), jnp.float32)],
        axis=-1)
    if b_pad > b:
        x_aug = jnp.pad(x_aug, ((0, b_pad - b), (0, 0)))

    grid = (b_pad // tile_b, t_pad // tile_t)

    grid_spec = pltpu.PrefetchScalarGridSpec(
        num_scalar_prefetch=0,
        grid=grid,
        in_specs=[
            pl.BlockSpec((tile_b, n_dim), lambda bi, ti: (bi, 0)),          # x (const over ti)
            pl.BlockSpec((n_dim, deg * tile_t), lambda bi, ti: (0, ti)),    # sel tile
            pl.BlockSpec((1, tile_t), lambda bi, ti: (0, ti)),              # coef tile
        ],
        out_specs=pl.BlockSpec((tile_b, 1), lambda bi, ti: (bi, 0)),        # accumulator block
    )

    # Explicit scoped-VMEM limit sized for the chosen tiles (safe on v5e/v6e and v7x).
    per_step = (2 * tile_b * n_dim * 4                 # x, double-buffered
                + 2 * n_dim * deg * tile_t * 2         # sel bf16, double-buffered
                + n_dim * deg * tile_t * 4             # in-kernel f32 cast of sel
                + tile_b * deg * tile_t * 4            # gather output g
                + 2 * tile_b * tile_t * 4              # product temporaries
                + 2 * 8 * tile_t * 4                   # coef tiles (lane rows)
                + 2 * tile_b * 128 * 4)                # out block (lane-padded), dbl-buffered
    vmem_limit = int(min(64 << 20, max(32 << 20, per_step + (8 << 20))))

    nb = grid[0]
    cost = pl.CostEstimate(
        flops=int(2 * b_pad * n_dim * deg * t_pad + (deg + 2) * b_pad * t_pad),
        transcendentals=0,
        bytes_accessed=int(b_pad * n_dim * 4
                           + nb * n_dim * deg * t_pad * 2
                           + nb * t_pad * 4
                           + b_pad * 4),
    )

    out = pl.pallas_call(
        _make_kernel(deg, tile_t),
        out_shape=jax.ShapeDtypeStruct((b_pad, 1), jnp.float32),
        grid_spec=grid_spec,
        compiler_params=pltpu.CompilerParams(
            dimension_semantics=("parallel", "arbitrary"),
            vmem_limit_bytes=vmem_limit,
        ),
        cost_estimate=cost,
    )(x_aug, sel_all, coef)

    return jnp.reshape(out[:b], orig_shape[:-1] + (1,))


if __name__ == "__main__":
    # Deterministic synthetic polynomial (the module's ParameterDict init just wraps these
    # scalars as parameters; values are set in-script, no checkpoint load).
    coefficients = {
        (): 0.5,
        (0,): 1.0,
        (1,): -2.0,
        (0, 1): 0.3,
        (2, 3, 4): 1.5,
        (5,): 0.7,
        (6, 7): -1.2,
        (1, 2, 3): 2.0,
    }
    N = 8
    x = jax.random.normal(jax.random.PRNGKey(0), (2, 4, N), dtype=jnp.float32)

    sel_all, coef, meta = build_dense_terms(coefficients, N)
    out = sparse_polynomial(x, sel_all, coef, meta)
    out = jax.block_until_ready(out)

    # Pure-JAX reference mirroring the PyTorch forward exactly (constant counted twice).
    ref = jnp.full(x.shape[:-1] + (1,), float(coefficients[()]), dtype=jnp.float32)
    for k, v in coefficients.items():
        if len(k) == 0:
            term = jnp.ones(x.shape[:-1] + (1,), dtype=jnp.float32)
        else:
            term = jnp.prod(x[..., list(k)], axis=-1, keepdims=True)
        ref = ref + float(v) * term

    assert out.shape == x.shape[:-1] + (1,)
    assert jnp.allclose(out, ref, atol=1e-5, rtol=1e-5), (out, ref)

    print("KERNEL_OK")
</pallas_src>

<mosaic_0001>
module attributes {stable_mosaic.version = 11 : i64} {
  func.func @kernel(%arg0: i32, %arg1: i32, %arg2: memref<8x16xf32, #tpu.memory_space<vmem>>, %arg3: memref<16x384xbf16, #tpu.memory_space<vmem>>, %arg4: memref<1x128xf32, #tpu.memory_space<vmem>>, %arg5: memref<8x1xf32, #tpu.memory_space<vmem>>) attributes {dimension_semantics = [#tpu.dimension_semantics<parallel>, #tpu.dimension_semantics<arbitrary>], iteration_bounds = array<i64: 1, 1>, scalar_prefetch = 0 : i64, scratch_operands = 0 : i64, tpu.core_type = #tpu.core_type<tc>, window_params = [{transform_indices = @transform_0, window_bounds = array<i64: 8, 16>}, {transform_indices = @transform_1, window_bounds = array<i64: 16, 384>}, {transform_indices = @transform_2, window_bounds = array<i64: 1, 128>}, {transform_indices = @transform_3, window_bounds = array<i64: 8, 1>}]} {
    %c0_i32 = arith.constant 0 : i32
    %0 = arith.cmpi eq, %arg1, %c0_i32 : i32
    %1 = arith.extui %0 : i1 to i32
    %c0_i32_0 = arith.constant 0 : i32
    %2 = arith.cmpi ne, %1, %c0_i32_0 : i32
    scf.if %2 {
      %cst_11 = arith.constant 0.000000e+00 : f32
      %20 = vector.broadcast %cst_11 : f32 to vector<8x1xf32>
      %c0_12 = arith.constant 0 : index
      %c0_13 = arith.constant 0 : index
      %21 = vector.load %arg5[%c0_12, %c0_13] : memref<8x1xf32, #tpu.memory_space<vmem>>, vector<8x1xf32>
      tpu.vector_store %arg5[%c0_12, %c0_13], %20 {strides = array<i32>} : memref<8x1xf32, #tpu.memory_space<vmem>>, vector<8x1xf32>,
    } else {
    }
    %c0 = arith.constant 0 : index
    %c0_1 = arith.constant 0 : index
    %3 = vector.load %arg2[%c0, %c0_1] : memref<8x16xf32, #tpu.memory_space<vmem>>, vector<8x16xf32>
    %c0_2 = arith.constant 0 : index
    %c0_3 = arith.constant 0 : index
    %4 = vector.load %arg3[%c0_2, %c0_3] : memref<16x384xbf16, #tpu.memory_space<vmem>>, vector<16x384xbf16>
    %5 = arith.extf %4 : vector<16x384xbf16> to vector<16x384xf32>
    %cst = arith.constant dense<0.000000e+00> : vector<8x384xf32>
    %6 = tpu.matmul %3, %5, %cst {dimension_numbers = #tpu.dot_dimension_numbers<[1], [0], [0], [1], [0, 0, 1, 1], [], []>} : vector<8x16xf32>, vector<16x384xf32>, vector<8x384xf32> -> vector<8x384xf32>
    %7 = vector.extract_strided_slice %6 {offsets = [0, 0], sizes = [8, 128], strides = [1, 1]} : vector<8x384xf32> to vector<8x128xf32>
    %8 = vector.extract_strided_slice %6 {offsets = [0, 128], sizes = [8, 128], strides = [1, 1]} : vector<8x384xf32> to vector<8x128xf32>
    %9 = arith.mulf %7, %8 : vector<8x128xf32>
    %10 = vector.extract_strided_slice %6 {offsets = [0, 256], sizes = [8, 128], strides = [1, 1]} : vector<8x384xf32> to vector<8x128xf32>
    %11 = arith.mulf %9, %10 : vector<8x128xf32>
    %c0_4 = arith.constant 0 : index
    %c0_5 = arith.constant 0 : index
    %12 = vector.load %arg5[%c0_4, %c0_5] : memref<8x1xf32, #tpu.memory_space<vmem>>, vector<8x1xf32>
    %c0_6 = arith.constant 0 : index
    %c0_7 = arith.constant 0 : index
    %13 = vector.load %arg4[%c0_6, %c0_7] : memref<1x128xf32, #tpu.memory_space<vmem>>, vector<1x128xf32>
    %14 = vector.broadcast %13 : vector<1x128xf32> to vector<8x128xf32>
    %15 = arith.mulf %11, %14 : vector<8x128xf32>
    %cst_8 = arith.constant dense<0.000000e+00> : vector<8xf32>
    %16 = vector.multi_reduction <add>, %15, %cst_8 [1] : vector<8x128xf32> to vector<8xf32>
    %17 = vector.shape_cast %16 : vector<8xf32> to vector<8x1xf32>
    %18 = arith.addf %12, %17 : vector<8x1xf32>
    %c0_9 = arith.constant 0 : index
    %c0_10 = arith.constant 0 : index
    %19 = vector.load %arg5[%c0_9, %c0_10] : memref<8x1xf32, #tpu.memory_space<vmem>>, vector<8x1xf32>
    tpu.vector_store %arg5[%c0_9, %c0_10], %18 {strides = array<i32>} : memref<8x1xf32, #tpu.memory_space<vmem>>, vector<8x1xf32>,
    return
  }
  func.func @transform_0(%arg0: i32, %arg1: i32) -> (i32, i32) {
    %c0_i32 = arith.constant 0 : i32
    %c0_i32_0 = arith.constant 0 : i32
    return %arg0, %c0_i32 : i32, i32
  }
  func.func @transform_1(%arg0: i32, %arg1: i32) -> (i32, i32) {
    %c0_i32 = arith.constant 0 : i32
    %c0_i32_0 = arith.constant 0 : i32
    return %c0_i32, %arg1 : i32, i32
  }
  func.func @transform_2(%arg0: i32, %arg1: i32) -> (i32, i32) {
    %c0_i32 = arith.constant 0 : i32
    %c0_i32_0 = arith.constant 0 : i32
    return %c0_i32, %arg1 : i32, i32
  }
  func.func @transform_3(%arg0: i32, %arg1: i32) -> (i32, i32) {
    %c0_i32 = arith.constant 0 : i32
    %c0_i32_0 = arith.constant 0 : i32
    return %arg0, %c0_i32 : i32, i32
  }
}

</mosaic_0001>

<bundles_post_ra>
// kernel: tpu_custom_call.1
= control target key start
LH: loop header
LB: loop body
LE: loop exit
PB: predicated region body
PF: predicated region fallthrough
CT: control target
= control target key end

     0   :  { %8 = vsyncpa [#allocation3], 0  ;;  %s248_s0 = inlined_call_operand.hbm [shape: f32[8,16], index: 0, kind: input, shape index: {}]   ;;  %s249_s1 = inlined_call_operand.hbm [shape: bf16[16,384], index: 1, kind: input, shape index: {}]   ;;  %s250_s2 = inlined_call_operand.vmem [shape: f32[1,128], index: 2, kind: input, shape index: {}]   ;;  %s251_s3 = inlined_call_operand.vmem [shape: f32[8,1], index: 3, kind: output, shape index: {}]  }
   0x1   :  { %s15_s14 = sshll.u32 %s248_s0, 4  ;;  %s16_s14 = int_to_ptr.hbm [resolvable:$true] %s15_s14 }
   0x2   :  { %9 = vsyncpa [#allocation5], 0  ;;  %s205_s15 = smov [#allocation2]   ;;  %s25_s19 = sshll.u32 %s249_s1, 4  ;;  %s26_s19 = int_to_ptr.hbm [resolvable:$true] %s25_s19 }
   0x3   :  { %s17_s16 = sshll.u32 %s205_s15, 4  ;;  %s206_s20 = smov [#allocation4]   ;;  %s18_s16 = int_to_ptr.vmem [resolvable:$true] %s17_s16 }
   0x4   :  { %20 = dma.hbm_to_vmem [thread:$0]  %s16_s14, 128, %s18_s16, [#allocation3]  }
   0x5   :  { %s27_s21 = sshll.u32 %s206_s20, 4  ;;  %s207_s22 = smov 192   ;;  %s28_s21 = int_to_ptr.vmem [resolvable:$true] %s27_s21 }
   0x6   :  { %s208_s23 = smov 12  }
   0x7   :  { %33 = dma.hbm_to_vmem [thread:$0]  %s26_s19, 384, %s28_s21, [#allocation5], %s207_s22, %s207_s22, %s208_s23  }
   0x8   :  { %201 = dma.done.wait [#allocation3], 128  }
   0x9   :  { %202 = vsyncadd [#allocation3], 4294967168 }
   0xa   :  { %203 = dma.done.wait [#allocation5], 384  }
   0xb   :  { %204 = vsyncadd [#allocation5], 4294966912  ;;  %v54_v0 = vld [vmem:[#allocation4 + $0x14] sm:$0xf]  ;;  %v52_v1 = vld [vmem:[#allocation4 + $0x8] sm:$0xf] }
   0xc   :  { %v60_v2 = vunpack.c.l.bf16 %v54_v0  ;;  %v57_v3 = vunpack.c.l.bf16 %v52_v1  ;;  %v53_v4 = vld [vmem:[#allocation4 + $0xc] sm:$0xff]  ;;  %v51_v5 = vld [vmem:[#allocation4] sm:$0xff]  ;;  %v50_v9 = vld [vmem:[#allocation2] sm:$0xff]  ;;  %vm61_vm0 = vcmask 130048   ;;  %vm48_vm1 = vcmask 7168  }
   0xd   :  { %v58_v6 = vunpack.c.l.bf16 %v53_v4  ;;  %v59_v7 = vunpack.c.h.bf16 %v53_v4  ;;  %v55_v8 = vunpack.c.l.bf16 %v51_v5  ;;  %v56_v10 = vunpack.c.h.bf16 %v51_v5  ;;  %v152_v15 = vld [vmem:[%s250_s2] ss:$0 sm:$0xff] }
   0xe   :  { %119 = vmatpush.msra.mxu2 %v60_v2  ;;  %v209_v11 = vmov 0.0  }
   0xf   :  { %79 = vmatpush.msra.mxu0 %v58_v6  ;;  %99 = vmatpush.msra.mxu1 %v59_v7  ;;  %49 = vst.msk [vmem:[%s251_s3] sm:$0xff] %vm48_vm1, %v209_v11 }
  0x10   :  { %120 = vmatpush.msra.mxu2 %v57_v3 }
  0x11   :  { %146 = vmatmul.msk.f32.vlgmr.msra.gmra.mxu2 %vm61_vm0, %v50_v9  ;;  %80 = vmatpush.msra.mxu0 %v55_v8 }
  0x12   :  { %100 = vmatpush.msra.mxu1 %v56_v10  ;;  %144 = vmatmul.msk.f32.vlgmr.msra.gmra.mxu0 %vm61_vm0, %v50_v9 }
  0x13   :  { %145 = vmatmul.msk.f32.vlgmr.msra.gmra.mxu1 %vm61_vm0, %v50_v9 }
  0x16   :  { %v127_v19 = vld [vmem:[%s251_s3] sm:$0xff] }
  0x8f   :  { %v82_v12 = vpop.f32.mrf.mxu0 }
  0x90   :  { %v102_v13 = vpop.f32.mrf.mxu1 }
  0x91   :  { %v125_v14 = vmul.f32 %v102_v13, %v82_v12 }
  0x94   :  { %v122_v16 = vpop.f32.mrf.mxu2 }
  0x95   :  { %v126_v17 = vmul.f32 %v125_v14, %v122_v16 }
  0x97   :  { %v132_v18 = vmul.f32 %v152_v15, %v126_v17 }
  0x99   :  { %133 = vadd.xlane.f32.xlu0 %v132_v18 }
 0x10c   :  { %v134_v20 = vpop.xlane.xlu0 %133 }
 0x10d   :  { %v135_v21 = vadd.f32 %v134_v20, %v127_v19 }
 0x10f   :  { %137 = vst.msk [vmem:[%s251_s3] sm:$0xff] %vm48_vm1, %v135_v21 }
 0x110   :  { %142 = vsyncpa [#allocation3], 1 }
 0x111   :  { %143 = vsyncpa [#allocation5], 1 }

</bundles_post_ra>
